<compile_context>
chip_gen: v7x
topology: tpu7x:2x2x1
jax: 0.10.0
libtpu: 0.0.40
codegen_flags: <defaults>
</compile_context>

<pallas_src>
from functools import partial

import jax
import jax.numpy as jnp
from jax.experimental import pallas as pl
from jax.experimental.pallas import tpu as pltpu


# ---------------------------------------------------------------------------
# Glue: 1-D bilinear interpolation matrix (half-pixel convention,
# align_corners=False, no antialiasing), matching torch.nn.functional.
# interpolate(mode="bilinear", align_corners=False).
# ---------------------------------------------------------------------------
def _interp_matrix(in_size: int, out_size: int) -> jnp.ndarray:
    if out_size == in_size:
        return jnp.eye(out_size, dtype=jnp.float32)
    scale = in_size / out_size
    j = jnp.arange(out_size, dtype=jnp.float32)
    src = (j + 0.5) * scale - 0.5
    src = jnp.clip(src, 0.0, float(in_size - 1))
    x0 = jnp.floor(src)
    w1 = src - x0
    w0 = 1.0 - w1
    x0i = x0.astype(jnp.int32)
    x1i = jnp.minimum(x0i + 1, in_size - 1)
    rows = jnp.arange(out_size)
    m = jnp.zeros((out_size, in_size), jnp.float32)
    m = m.at[rows, x0i].add(w0)
    m = m.at[rows, x1i].add(w1)
    return m


# ---------------------------------------------------------------------------
# Glue: torchvision output-size logic (int size = match shorter edge, keep
# aspect ratio, optional max_size clamp; tuple size = exact (h, w)).
# ---------------------------------------------------------------------------
def _compute_output_size(in_h: int, in_w: int, size, max_size=None):
    if isinstance(size, (tuple, list)):
        if len(size) == 1:
            size = size[0]
        else:
            return int(size[0]), int(size[1])
    short, long = (in_h, in_w) if in_h <= in_w else (in_w, in_h)
    new_short, new_long = size, int(size * long / short)
    if max_size is not None:
        if new_long > max_size:
            new_short, new_long = int(max_size * new_short / new_long), max_size
    new_h, new_w = (new_short, new_long) if in_h <= in_w else (new_long, new_short)
    return new_h, new_w


def _to_out_dtype(v, dtype):
    """Cast accumulator to output dtype; round+clamp for integer outputs."""
    if jnp.issubdtype(dtype, jnp.integer):
        info = jnp.iinfo(dtype)
        v = jnp.clip(jnp.round(v), info.min, info.max)
    return v.astype(dtype)


# ---------------------------------------------------------------------------
# Pallas kernel: C_BLK (Hin, Win) channel planes -> (Hout, Wout) planes.
# ---------------------------------------------------------------------------
def _resize_kernel(row_w_ref, col_w_ref, x_ref, o_ref):
    c_blk, in_h, in_w = x_ref.shape
    out_w = col_w_ref.shape[1]
    w_dtype = col_w_ref.dtype

    # W-axis contraction fused over all channels in the block: one big matmul
    # with M = C_BLK*Hin (feeds the MXU far better than per-channel M = Hout).
    x2 = x_ref[...].reshape(c_blk * in_h, in_w)
    if x2.dtype != w_dtype:
        x2 = x2.astype(w_dtype)           # only integer / mismatched inputs cast
    tmp = jnp.dot(x2, col_w_ref[...], preferred_element_type=jnp.float32)
    tmp = tmp.reshape(c_blk, in_h, out_w)

    # H-axis contraction per channel (weights shared across channels).
    row_w = row_w_ref[...]
    outs = []
    for c in range(c_blk):
        t_c = tmp[c]
        if w_dtype != jnp.float32:
            t_c = t_c.astype(w_dtype)     # bf16 MXU path keeps f32 accumulation
        outs.append(jnp.dot(row_w, t_c, preferred_element_type=jnp.float32))

    packed = o_ref.shape[0] == 1          # lane-packed output layout?
    if packed:
        res = outs[0] if c_blk == 1 else jnp.concatenate(outs, axis=-1)
        o_ref[0] = _to_out_dtype(res, o_ref.dtype)
    else:
        for c in range(c_blk):
            o_ref[c] = _to_out_dtype(outs[c], o_ref.dtype)


# ---------------------------------------------------------------------------
# Channel-block selection: biggest divisor of N*C that fits a conservative
# VMEM budget, capped, and (when possible) keeping >= 2 grid steps so both
# v7x TensorCores get work.
# ---------------------------------------------------------------------------
def _pick_c_blk(nc, in_h, in_w, out_h, out_w, x_bytes, w_bytes):
    budget = 20 * 1024 * 1024
    fixed = 2 * (out_h * in_h + in_w * out_w) * w_bytes        # weights (double-buffered)

    def est(d):
        blk_in = 2 * d * in_h * in_w * x_bytes                 # input block, 2 buffers
        blk_out = 2 * d * out_h * out_w * x_bytes              # output block, 2 buffers
        scratch = d * (in_h + out_h) * out_w * 4               # f32 intermediates
        return fixed + blk_in + blk_out + scratch

    divisors = [d for d in range(1, min(nc, 16) + 1) if nc % d == 0]
    feasible = [d for d in divisors if est(d) <= budget] or [1]
    pref = [d for d in feasible if nc // d >= 2] or feasible   # megacore: >=2 steps
    return max(pref)


# ---------------------------------------------------------------------------
# Wrapper
# ---------------------------------------------------------------------------
@partial(jax.jit, static_argnums=(1, 2))
def _resize_nchw(x: jnp.ndarray, out_h: int, out_w: int) -> jnp.ndarray:
    """Bilinear resize of an NCHW tensor to (out_h, out_w)."""
    n, c, in_h, in_w = x.shape
    nc = n * c
    x_flat = x.reshape(nc, in_h, in_w)

    # bf16 inputs stay bf16 into the MXU (f32 accumulation); f32/int keep f32
    # weights so numerics match the PyTorch float path.
    compute_dtype = jnp.bfloat16 if x.dtype == jnp.dtype(jnp.bfloat16) else jnp.float32
    row_w = _interp_matrix(in_h, out_h).astype(compute_dtype)      # (Hout, Hin)
    col_w = _interp_matrix(in_w, out_w).T.astype(compute_dtype)    # (Win, Wout)

    x_bytes = jnp.dtype(x.dtype).itemsize
    w_bytes = jnp.dtype(compute_dtype).itemsize
    c_blk = _pick_c_blk(nc, in_h, in_w, out_h, out_w, x_bytes, w_bytes)
    grid = (nc // c_blk,)

    # Lane-dense output packing when the target width is lane-sparse (<128).
    packed = (out_w < 128) and (c_blk > 1)
    if packed:
        out_shape = jax.ShapeDtypeStruct((nc // c_blk, out_h, c_blk * out_w), x.dtype)
        out_spec = pl.BlockSpec((1, out_h, c_blk * out_w), lambda i: (i, 0, 0))
    else:
        out_shape = jax.ShapeDtypeStruct((nc, out_h, out_w), x.dtype)
        out_spec = pl.BlockSpec((c_blk, out_h, out_w), lambda i: (i, 0, 0))

    cost = pl.CostEstimate(
        flops=2 * nc * out_w * in_h * (in_w + out_h),
        transcendentals=0,
        bytes_accessed=(nc * in_h * in_w + nc * out_h * out_w) * x_bytes
        + (out_h * in_h + in_w * out_w) * w_bytes,
    )

    # TODO(synk): for very large images/outputs add Hout/Wout grid tiling with
    # band-limited (2-tap) input row/col fetches; current kernel keeps whole
    # planes per step (fine for typical dataset-transform sizes).
    out = pl.pallas_call(
        _resize_kernel,
        out_shape=out_shape,
        grid_spec=pltpu.PrefetchScalarGridSpec(
            num_scalar_prefetch=0,
            grid=grid,
            in_specs=[
                pl.BlockSpec((out_h, in_h), lambda i: (0, 0)),        # row weights (reused)
                pl.BlockSpec((in_w, out_w), lambda i: (0, 0)),        # col weights (reused)
                pl.BlockSpec((c_blk, in_h, in_w), lambda i: (i, 0, 0)),
            ],
            out_specs=out_spec,
        ),
        compiler_params=pltpu.CompilerParams(
            dimension_semantics=("parallel",),
            vmem_limit_bytes=32 * 1024 * 1024,
        ),
        cost_estimate=cost,
    )(row_w, col_w, x_flat)

    if packed:
        out = out.reshape(nc // c_blk, out_h, c_blk, out_w).transpose(0, 2, 1, 3)
    return out.reshape(n, c, out_h, out_w)


# ---------------------------------------------------------------------------
# Module equivalent
# ---------------------------------------------------------------------------
class Resize:
    """JAX/Pallas equivalent of the PyTorch Resize transform (bilinear)."""

    def __init__(self, size, max_size=None, antialias=None):
        self.size = size
        self.max_size = max_size
        self.antialias = antialias  # TODO(synk): antialias=True (windowed filtering) not implemented; matches antialias=False tensor path.

    def __call__(self, data_dict):
        out = {}
        for k, v in data_dict.items():
            n, c, h, w = v.shape
            out_h, out_w = _compute_output_size(h, w, self.size, self.max_size)
            out[k] = _resize_nchw(v, out_h, out_w)
        return out


# ---------------------------------------------------------------------------
# Pure-JAX reference (same interpolation matrices, einsum contraction).
# ---------------------------------------------------------------------------
def _resize_reference(x, out_h, out_w):
    rw = _interp_matrix(x.shape[2], out_h)          # (Hout, Hin)
    cw = _interp_matrix(x.shape[3], out_w)          # (Wout, Win)
    y = jnp.einsum("oh,nchw,vw->ncov", rw, x.astype(jnp.float32), cw)
    return y.astype(x.dtype)


if __name__ == "__main__":
    key = jax.random.PRNGKey(0)
    k1, k2 = jax.random.split(key)

    # Small deterministic NCHW inputs.
    image = jax.random.normal(k1, (2, 4, 16, 16), dtype=jnp.float32)
    depth = jax.random.normal(k2, (2, 1, 16, 12), dtype=jnp.float32)
    data = {"image": image, "depth": depth}

    resize = Resize(size=(8, 10))
    out = resize(data)
    out = jax.tree_util.tree_map(jax.block_until_ready, out)

    assert out["image"].shape == (2, 4, 8, 10), out["image"].shape
    assert out["depth"].shape == (2, 1, 8, 10), out["depth"].shape
    assert out["image"].dtype == image.dtype

    ref_img = _resize_reference(image, 8, 10)
    ref_dep = _resize_reference(depth, 8, 10)
    assert jnp.allclose(out["image"], ref_img, atol=1e-5, rtol=1e-5)
    assert jnp.allclose(out["depth"], ref_dep, atol=1e-5, rtol=1e-5)

    # Also exercise the int-size (shorter-edge) path.
    resize_int = Resize(size=8)
    out_int = resize_int({"depth": depth})
    out_int = jax.tree_util.tree_map(jax.block_until_ready, out_int)
    assert out_int["depth"].shape == (2, 1, 10, 8), out_int["depth"].shape

    print("KERNEL_OK")
</pallas_src>

<mosaic_0001>
module attributes {stable_mosaic.version = 11 : i64} {
  func.func @_resize_kernel(%arg0: i32, %arg1: memref<8x16xf32, #tpu.memory_space<vmem>>, %arg2: memref<16x10xf32, #tpu.memory_space<vmem>>, %arg3: memref<4x16x16xf32, #tpu.memory_space<vmem>>, %arg4: memref<1x8x40xf32, #tpu.memory_space<vmem>>) attributes {dimension_semantics = [#tpu.dimension_semantics<parallel>], iteration_bounds = array<i64: 2>, scalar_prefetch = 0 : i64, scratch_operands = 0 : i64, tpu.core_type = #tpu.core_type<tc>, window_params = [{pipeline_mode = #tpu.pipeline_mode<synchronous>, transform_indices = @transform_0, window_bounds = array<i64: 8, 16>}, {pipeline_mode = #tpu.pipeline_mode<synchronous>, transform_indices = @transform_1, window_bounds = array<i64: 16, 10>}, {transform_indices = @transform_2, window_bounds = array<i64: 4, 16, 16>}, {transform_indices = @transform_3, window_bounds = array<i64: 1, 8, 40>}]} {
    %c0 = arith.constant 0 : index
    %c0_0 = arith.constant 0 : index
    %c0_1 = arith.constant 0 : index
    %0 = vector.load %arg3[%c0, %c0_0, %c0_1] : memref<4x16x16xf32, #tpu.memory_space<vmem>>, vector<4x16x16xf32>
    %1 = vector.shape_cast %0 : vector<4x16x16xf32> to vector<64x16xf32>
    %c0_2 = arith.constant 0 : index
    %c0_3 = arith.constant 0 : index
    %2 = vector.load %arg2[%c0_2, %c0_3] : memref<16x10xf32, #tpu.memory_space<vmem>>, vector<16x10xf32>
    %cst = arith.constant dense<0.000000e+00> : vector<64x10xf32>
    %3 = tpu.matmul %1, %2, %cst {dimension_numbers = #tpu.dot_dimension_numbers<[1], [0], [0], [1], [0, 0, 1, 1], [], []>} : vector<64x16xf32>, vector<16x10xf32>, vector<64x10xf32> -> vector<64x10xf32>
    %4 = vector.shape_cast %3 : vector<64x10xf32> to vector<4x16x10xf32>
    %c0_4 = arith.constant 0 : index
    %c0_5 = arith.constant 0 : index
    %5 = vector.load %arg1[%c0_4, %c0_5] : memref<8x16xf32, #tpu.memory_space<vmem>>, vector<8x16xf32>
    %6 = vector.extract_strided_slice %4 {offsets = [0, 0, 0], sizes = [1, 16, 10], strides = [1, 1, 1]} : vector<4x16x10xf32> to vector<1x16x10xf32>
    %7 = vector.shape_cast %6 : vector<1x16x10xf32> to vector<16x10xf32>
    %cst_6 = arith.constant dense<0.000000e+00> : vector<8x10xf32>
    %8 = tpu.matmul %5, %7, %cst_6 {dimension_numbers = #tpu.dot_dimension_numbers<[1], [0], [0], [1], [0, 0, 1, 1], [], []>} : vector<8x16xf32>, vector<16x10xf32>, vector<8x10xf32> -> vector<8x10xf32>
    %9 = vector.extract_strided_slice %4 {offsets = [1, 0, 0], sizes = [1, 16, 10], strides = [1, 1, 1]} : vector<4x16x10xf32> to vector<1x16x10xf32>
    %10 = vector.shape_cast %9 : vector<1x16x10xf32> to vector<16x10xf32>
    %cst_7 = arith.constant dense<0.000000e+00> : vector<8x10xf32>
    %11 = tpu.matmul %5, %10, %cst_7 {dimension_numbers = #tpu.dot_dimension_numbers<[1], [0], [0], [1], [0, 0, 1, 1], [], []>} : vector<8x16xf32>, vector<16x10xf32>, vector<8x10xf32> -> vector<8x10xf32>
    %12 = vector.extract_strided_slice %4 {offsets = [2, 0, 0], sizes = [1, 16, 10], strides = [1, 1, 1]} : vector<4x16x10xf32> to vector<1x16x10xf32>
    %13 = vector.shape_cast %12 : vector<1x16x10xf32> to vector<16x10xf32>
    %cst_8 = arith.constant dense<0.000000e+00> : vector<8x10xf32>
    %14 = tpu.matmul %5, %13, %cst_8 {dimension_numbers = #tpu.dot_dimension_numbers<[1], [0], [0], [1], [0, 0, 1, 1], [], []>} : vector<8x16xf32>, vector<16x10xf32>, vector<8x10xf32> -> vector<8x10xf32>
    %15 = vector.extract_strided_slice %4 {offsets = [3, 0, 0], sizes = [1, 16, 10], strides = [1, 1, 1]} : vector<4x16x10xf32> to vector<1x16x10xf32>
    %16 = vector.shape_cast %15 : vector<1x16x10xf32> to vector<16x10xf32>
    %cst_9 = arith.constant dense<0.000000e+00> : vector<8x10xf32>
    %17 = tpu.matmul %5, %16, %cst_9 {dimension_numbers = #tpu.dot_dimension_numbers<[1], [0], [0], [1], [0, 0, 1, 1], [], []>} : vector<8x16xf32>, vector<16x10xf32>, vector<8x10xf32> -> vector<8x10xf32>
    %18 = tpu.concatenate %8, %11, %14, %17 in 1 : vector<8x10xf32>, vector<8x10xf32>, vector<8x10xf32>, vector<8x10xf32> -> vector<8x40xf32>
    %c0_10 = arith.constant 0 : index
    %c0_11 = arith.constant 0 : index
    %c0_12 = arith.constant 0 : index
    %19 = vector.load %arg4[%c0_10, %c0_11, %c0_12] : memref<1x8x40xf32, #tpu.memory_space<vmem>>, vector<1x8x40xf32>
    %20 = vector.shape_cast %19 : vector<1x8x40xf32> to vector<8x40xf32>
    %21 = vector.shape_cast %18 : vector<8x40xf32> to vector<1x8x40xf32>
    tpu.vector_store %arg4[%c0_10, %c0_11, %c0_12], %21 {strides = array<i32>} : memref<1x8x40xf32, #tpu.memory_space<vmem>>, vector<1x8x40xf32>,
    return
  }
  func.func @transform_0(%arg0: i32) -> (i32, i32) {
    %c0_i32 = arith.constant 0 : i32
    %c0_i32_0 = arith.constant 0 : i32
    %c0_i32_1 = arith.constant 0 : i32
    return %c0_i32, %c0_i32_0 : i32, i32
  }
  func.func @transform_1(%arg0: i32) -> (i32, i32) {
    %c0_i32 = arith.constant 0 : i32
    %c0_i32_0 = arith.constant 0 : i32
    %c0_i32_1 = arith.constant 0 : i32
    return %c0_i32, %c0_i32_0 : i32, i32
  }
  func.func @transform_2(%arg0: i32) -> (i32, i32, i32) {
    %c0_i32 = arith.constant 0 : i32
    %c0_i32_0 = arith.constant 0 : i32
    %c0_i32_1 = arith.constant 0 : i32
    return %arg0, %c0_i32, %c0_i32_0 : i32, i32, i32
  }
  func.func @transform_3(%arg0: i32) -> (i32, i32, i32) {
    %c0_i32 = arith.constant 0 : i32
    %c0_i32_0 = arith.constant 0 : i32
    %c0_i32_1 = arith.constant 0 : i32
    return %arg0, %c0_i32, %c0_i32_0 : i32, i32, i32
  }
}

</mosaic_0001>

<bundles_post_ra>
// kernel: _resize_nchw.1
= control target key start
LH: loop header
LB: loop body
LE: loop exit
PB: predicated region body
PF: predicated region fallthrough
CT: control target
= control target key end

     0   :  { %s825_s12 = smov 0   ;;  %s872_s0 = inlined_call_operand.vmem [shape: f32[8,16], index: 0, kind: input, shape index: {}]   ;;  %s873_s1 = inlined_call_operand.vmem [shape: f32[16,10], index: 1, kind: input, shape index: {}]   ;;  %s874_s2 = inlined_call_operand.vmem [shape: f32[8,16,16], index: 2, kind: input, shape index: {}]   ;;  %s875_s3 = inlined_call_operand.vmem [shape: f32[2,8,40], index: 3, kind: output, shape index: {}]  }
   0x1 LB: > { %s831_s13 = sadd.s32 4294967295, %s797_s12   ;;  %p675_p0 = scmp.ge.s32.totalorder %s797_s12, 1  ;;  %s797_s12 = sphi %s825_s12, %s13_s12  }
   0x2   : > { %p139_p1 = scmp.lt.s32.totalorder %s797_s12, 3 }
   0x4   : > { %p140_p2 = pnand %p675_p0, %p139_p1 }
   0x5   : > { %v182_v0 = vld [vmem:[%s873_s1] sm:$0xff] (!%p140_p2)  ;;  %v183_v1 = vld [vmem:[%s873_s1 + $0x8] sm:$0xff] (!%p140_p2)  ;;  %s676_s18 = sshll.u32 (!%p140_p2), %s831_s13, 2  ;;  %vm184_vm0 = vcmask (!%p140_p2), 130048   ;;  %v799_v11 = vmov (!%p140_p2), 0.0|0.0   ;;  %vm800_vm1 = vmmov (!%p140_p2), 0  }
   0x6   : > { %143 = sbr.rel (%p140_p2) target bundleno = 577 (0x241), region = 32  ;;  %v761_v2 = vpack.c.bf16 (!%p140_p2), %v183_v1, %v182_v0  ;;  %p164_p3 = scmp.lt.s32.totalorder (!%p140_p2), %s676_s18, 7  ;;  %765 = vmatprep.subr.bf16.mxu1 (!%p140_p2), %v799_v11  ;;  %v801_v12 = vmov (!%p140_p2), 0.0   ;;  %v314_v17 = vld [vmem:[%s872_s0] sm:$0xff] (!%p140_p2)  ;;  %vm610_vm2 = vcmask (!%p140_p2), 80896   ;;  %vm612_vm3 = vcmask (!%p140_p2), 162816  }
   0x7   : > { %737 = vmatprep.mubr.msk.f32.mxu1 (!%p140_p2), %vm800_vm1, %v801_v12  ;;  %s802_s25 = smov (!%p140_p2), 10   ;;  %s803_s26 = smov (!%p140_p2), 20   ;;  %vm614_vm4 = vcmask (!%p140_p2), 244736   ;;  %vm616_vm5 = vcmask (!%p140_p2), 326656  }
   0x8   : > { %762 = vmatprep.subr.bf16.mxu0 (!%p140_p2), %v761_v2  ;;  %s804_s27 = smov (!%p140_p2), 30   ;;  %p170_p4 = scmp.lt.s32.totalorder (!%p140_p2), %s831_s13, 1 }
   0x9   : > { %764 = vmatpush3.bf16.msra.mxu0 (!%p140_p2), %v761_v2 }
   0xd   : > { %s877_s18 = smov (!%p164_p3, %s676_s18), 7  ;;  %s879_s13 = smov (!%p170_p4, %s831_s13), 1 }
   0xe   : > { %s694_s19 = sshll.u32 %s877_s18, 4  ;;  %s679_s28 = sshll.u32 %s879_s13, 3 }
   0xf   : > { %s168_s22 = scalar_lea.vmem %s874_s2, %s694_s19  ;;  %s173_s4 = scalar_lea.vmem %s875_s3, %s679_s28 }
  0x10   : > { %v174_v3 = vld [vmem:[%s168_s22] sm:$0xff]  ;;  %v175_v4 = vld [vmem:[%s168_s22 + $0x8] sm:$0xff]  ;;  %v176_v5 = vld [vmem:[%s168_s22 + $0x10] sm:$0xff] }
  0x11   : > { %721 = vmatprep.mubr.msk.f32.mxu0 %vm184_vm0, %v174_v3  ;;  %v177_v6 = vld [vmem:[%s168_s22 + $0x18] sm:$0xff]  ;;  %v178_v7 = vld [vmem:[%s168_s22 + $0x20] sm:$0xff]  ;;  %v179_v8 = vld [vmem:[%s168_s22 + $0x28] sm:$0xff] }
  0x12   : > { %722 = vmatmul.mubr.msk.f32.vlgmr.msra.gmra.mrb[0].mxu0 %vm184_vm0, %v175_v4  ;;  %v180_v9 = vld [vmem:[%s168_s22 + $0x30] sm:$0xff]  ;;  %v181_v10 = vld [vmem:[%s168_s22 + $0x38] sm:$0xff] }
  0x13   : > { %724 = vmatprep.mubr.msk.f32.mxu0 %vm184_vm0, %v176_v5 }
  0x16   : > { %725 = vmatmul.mubr.msk.f32.gmra.mrb[2].mxu0 %vm184_vm0, %v177_v6 }
  0x17   : > { %727 = vmatprep.mubr.msk.f32.mxu0 %vm184_vm0, %v178_v7 }
  0x1a   : > { %728 = vmatmul.mubr.msk.f32.gmra.mrb[4].mxu0 %vm184_vm0, %v179_v8 }
  0x1b   : > { %730 = vmatprep.mubr.msk.f32.mxu0 %vm184_vm0, %v180_v9 }
  0x1e   : > { %731 = vmatmul.mubr.msk.f32.gmra.mrb[6].mxu0 %vm184_vm0, %v181_v10 }
  0xe5   : > { %v723_v13 = vpop.f32.mrb[0].mxu0 }
  0xe6   : > { %v275_v14 = vpop.f32.mrb[1].mxu0 }
  0xe7   : > { %v766_v15 = vpack.c.bf16 %v723_v13, %v275_v14 }
  0xe9   : > { %v726_v16 = vpop.f32.mrb[2].mxu0  ;;  %767 = vmatpush3.bf16.msra.mxu1 %v766_v15 }
  0xea   : > { %v285_v18 = vpop.f32.mrb[3].mxu0  ;;  %768 = vmatprep.subr.bf16.mxu1 %v799_v11 }
  0xeb   : > { %v769_v19 = vpack.c.bf16 %v726_v16, %v285_v18 }
  0xec   : > { %738 = vmatmul.mubr.msk.f32.vlgmr.msra.gmra.mrb[0].mxu1 %vm184_vm0, %v314_v17 }
  0xed   : > { %v729_v20 = vpop.f32.mrb[4].mxu0  ;;  %770 = vmatpush3.bf16.msra.mxu1 %v769_v19  ;;  %744 = vmatprep.mubr.msk.f32.mxu1 %vm800_vm1, %v801_v12 }
  0xee   : > { %v295_v21 = vpop.f32.mrb[5].mxu0  ;;  %771 = vmatprep.subr.bf16.mxu1 %v799_v11 }
  0xef   : > { %v772_v22 = vpack.c.bf16 %v729_v20, %v295_v21 }
  0xf0   : > { %745 = vmatmul.mubr.msk.f32.vlgmr.msra.gmra.mrb[2].mxu1 %vm184_vm0, %v314_v17 }
  0xf1   : > { %v732_v23 = vpop.f32.mrb[6].mxu0  ;;  %773 = vmatpush3.bf16.msra.mxu1 %v772_v22  ;;  %751 = vmatprep.mubr.msk.f32.mxu1 %vm800_vm1, %v801_v12 }
  0xf2   : > { %v305_v24 = vpop.f32.mrb[7].mxu0  ;;  %774 = vmatprep.subr.bf16.mxu1 %v799_v11 }
  0xf3   : > { %v775_v25 = vpack.c.bf16 %v732_v23, %v305_v24 }
  0xf4   : > { %752 = vmatmul.mubr.msk.f32.vlgmr.msra.gmra.mrb[4].mxu1 %vm184_vm0, %v314_v17 }
  0xf5   : > { %776 = vmatpush3.bf16.msra.mxu1 %v775_v25  ;;  %758 = vmatprep.mubr.msk.f32.mxu1 %vm800_vm1, %v801_v12 }
  0xf8   : > { %759 = vmatmul.mubr.msk.f32.vlgmr.msra.gmra.mrb[6].mxu1 %vm184_vm0, %v314_v17 }
 0x1bf   : > { %v384_v26 = vpop.f32.mrb[0].mxu1 }
 0x1c0   : > { %v739_v27 = vpop.f32.mrb[1].mxu1 }
 0x1c3   : > { %v454_v28 = vpop.f32.mrb[2].mxu1 }
 0x1c4   : > { %599 = vrot.lane.b32.xlu0 %v454_v28, %s802_s25  ;;  %v746_v29 = vpop.f32.mrb[3].mxu1 }
 0x1c7   : > { %v524_v30 = vpop.f32.mrb[4].mxu1 }
 0x1c8   : > { %603 = vrot.lane.b32.xlu0 %v524_v30, %s803_s26  ;;  %v753_v31 = vpop.f32.mrb[5].mxu1 }
 0x1cb   : > { %v594_v32 = vpop.f32.mrb[6].mxu1 }
 0x1cc   : > { %607 = vrot.lane.b32.xlu1 %v594_v32, %s804_s27  ;;  %v760_v33 = vpop.f32.mrb[7].mxu1 }
 0x236   : > { %v600_v34 = vpop.permute.xlu0 %599 }
 0x237   : > { %v611_v36 = vsel %vm610_vm2, %v384_v26, %v600_v34 }
 0x23a   : > { %v604_v35 = vpop.permute.xlu0 %603 }
 0x23b   : > { %v613_v37 = vsel %vm612_vm3, %v611_v36, %v604_v35 }
 0x23e   : > { %v608_v38 = vpop.permute.xlu1 %607 }
 0x23f   : > { %v615_v39 = vsel %vm614_vm4, %v613_v37, %v608_v38 }
 0x240   : > { %617 = vst.msk [vmem:[%s173_s4] sm:$0xff] %vm616_vm5, %v615_v39 }
 0x241 PF: > { %s13_s12 = sadd.s32 1, %s797_s12  }
 0x242   : > { %p10_p5 = scmp.ge.s32.totalorder %s13_s12, 4  }
 0x244   :  { %12 = sbr.rel (!%p10_p5) target bundleno = 1 (0x1), region = 62 }

</bundles_post_ra>
